<compile_context>
chip_gen: v7x
topology: tpu7x:2x2x1
jax: 0.10.0
libtpu: 0.0.40
codegen_flags: <defaults>
</compile_context>

<pallas_src>
import jax
import jax.numpy as jnp
from jax.experimental import pallas as pl
from jax.experimental.pallas import tpu as pltpu


# ---------------------------------------------------------------------------
# Parameter-selection logic (mirrors should_decay_parameter / get_keys_to_decay)
# ---------------------------------------------------------------------------
def should_decay_parameter(name: str, param: jnp.ndarray) -> bool:
    # requires_grad is always True for our synthetic params
    lname = name.lower()
    if "batchnorm" in lname or "bn" in lname or "bias" in lname:
        return False
    if param.ndim == 1:
        return False
    return True


def get_keys_to_decay(params: dict) -> list:
    return [name for name, p in params.items() if should_decay_parameter(name, p)]


# ---------------------------------------------------------------------------
# Pallas kernel: sum of squares over a 2-D parameter view
# ---------------------------------------------------------------------------
_MAX_BLOCK_BYTES = 2 * 1024 * 1024  # per input buffer (double-buffered by Pallas)


def _make_sumsq_kernel(lead: int, bt: int, last: int, ragged: bool):
    def kernel(x_ref, o_ref, acc_ref):
        @pl.when(pl.program_id(0) == 0)
        def _():
            acc_ref[...] = jnp.zeros_like(acc_ref)

        xb = x_ref[...].astype(jnp.float32)
        if ragged:
            # Last block extends past the array edge; mask out-of-bounds rows.
            row0 = pl.program_id(0) * bt
            rows = jax.lax.broadcasted_iota(jnp.int32, (bt, last), 0) + row0
            xb = jnp.where(rows < lead, xb, jnp.float32(0.0))

        # Pure VPU elementwise accumulate; hidden under the DMA roofline.
        acc_ref[...] += xb * xb

        @pl.when(pl.program_id(0) == pl.num_programs(0) - 1)
        def _():
            # Single cross-lane/sublane reduce, once per parameter.
            o_ref[...] = jnp.sum(acc_ref[...], axis=(0, 1), keepdims=True)

    return kernel


def _param_sum_sq(p: jnp.ndarray) -> jnp.ndarray:
    """sum(p**2) as f32, reading p directly (no concat / pad / upcast copies)."""
    n = int(p.size)
    if n == 0:
        return jnp.float32(0.0)

    # 2-D view of the parameter (collapse reshapes are free for row-major data).
    if p.ndim == 1:
        p2 = p.reshape(1, n)
    elif n % 128 == 0:
        p2 = p.reshape(n // 128, 128)          # lane-dense layout
    else:
        p2 = p.reshape(-1, p.shape[-1])        # keep native trailing dim
    lead, last = p2.shape

    # Pick the largest leading-dim tile that keeps one buffer <= _MAX_BLOCK_BYTES
    # (accounting for 128-lane VMEM padding of the trailing dim).
    padded_last = ((last + 127) // 128) * 128
    row_bytes = padded_last * p2.dtype.itemsize
    max_rows = max(16, (_MAX_BLOCK_BYTES // row_bytes) // 16 * 16)

    if lead <= max_rows:
        bt, num_blocks, ragged = lead, 1, False   # full array as one block
    else:
        bt = max_rows                              # multiple of 8 (and 16 for bf16)
        num_blocks = (lead + bt - 1) // bt
        ragged = (lead % bt) != 0

    kernel = _make_sumsq_kernel(lead, bt, last, ragged)

    out = pl.pallas_call(
        kernel,
        out_shape=jax.ShapeDtypeStruct((1, 1), jnp.float32),
        grid_spec=pltpu.PrefetchScalarGridSpec(
            num_scalar_prefetch=0,
            grid=(num_blocks,),
            in_specs=[pl.BlockSpec((bt, last), lambda i: (i, 0))],
            out_specs=pl.BlockSpec((1, 1), lambda i: (0, 0)),
            scratch_shapes=[pltpu.VMEM((bt, last), jnp.float32)],
        ),
        compiler_params=pltpu.CompilerParams(
            dimension_semantics=("arbitrary",),      # reduction axis -> resident acc
            vmem_limit_bytes=32 * 1024 * 1024,       # explicit; safe on v5e/v6e/v7x
        ),
    )(p2)
    return out[0, 0]


def l2_loss_pallas(params: dict, alpha: float) -> jnp.ndarray:
    """Computes alpha * 0.5 * sum(p**2) over decayable params via Pallas."""
    keys = get_keys_to_decay(params)
    if not keys:  # guard: no decayable parameters
        return jnp.float32(0.0)
    partials = [_param_sum_sq(params[k]) for k in keys]
    total = jnp.sum(jnp.stack(partials))
    return total * jnp.float32(0.5 * alpha)


# ---------------------------------------------------------------------------
# Main: build a deterministic synthetic "model" state and run the kernel
# ---------------------------------------------------------------------------
if __name__ == "__main__":
    key = jax.random.PRNGKey(0)
    k1, k2, k3, k4, k5 = jax.random.split(key, 5)

    # Synthetic model parameters (NCHW conv weights, linear weights, bn, biases)
    params = {
        "conv1.weight": jax.random.normal(k1, (8, 4, 3, 3), jnp.float32),   # decay
        "conv1.bias": jax.random.normal(k2, (8,), jnp.float32),             # skip (bias)
        "bn1.weight": jnp.ones((8,), jnp.float32),                          # skip (bn, 1-D)
        "bn1.bias": jnp.zeros((8,), jnp.float32),                           # skip
        "fc1.weight": jax.random.normal(k3, (32, 64), jnp.float32),         # decay
        "fc1.bias": jax.random.normal(k4, (32,), jnp.float32),              # skip (bias)
        "fc2.weight": jax.random.normal(k5, (10, 32), jnp.float32),         # decay
        "fc2.bias": jnp.zeros((10,), jnp.float32),                          # skip
    }
    alpha = 1e-4

    loss = l2_loss_pallas(params, alpha)
    loss = jax.block_until_ready(loss)

    # Pure-JAX reference check
    ref = sum(
        0.5 * jnp.sum(params[k].astype(jnp.float32) ** 2)
        for k in get_keys_to_decay(params)
    ) * alpha
    assert jnp.allclose(loss, ref, rtol=1e-5, atol=1e-6), (loss, ref)

    print("KERNEL_OK")
</pallas_src>

<mosaic_0001>
module attributes {stable_mosaic.version = 11 : i64} {
  func.func @kernel(%arg0: i32, %arg1: memref<96x3xf32, #tpu.memory_space<vmem>>, %arg2: memref<1x1xf32, #tpu.memory_space<vmem>>, %arg3: memref<96x3xf32, #tpu.memory_space<vmem>>) attributes {dimension_semantics = [#tpu.dimension_semantics<arbitrary>], iteration_bounds = array<i64: 1>, scalar_prefetch = 0 : i64, scratch_operands = 1 : i64, tpu.core_type = #tpu.core_type<tc>, window_params = [{transform_indices = @transform_0, window_bounds = array<i64: 96, 3>}, {pipeline_mode = #tpu.pipeline_mode<synchronous>, transform_indices = @transform_1, window_bounds = array<i64: 1, 1>}]} {
    %c0_i32 = arith.constant 0 : i32
    %0 = arith.cmpi eq, %arg0, %c0_i32 : i32
    %1 = arith.extui %0 : i1 to i32
    %c0_i32_0 = arith.constant 0 : i32
    %2 = arith.cmpi ne, %1, %c0_i32_0 : i32
    scf.if %2 {
      %cst = arith.constant 0.000000e+00 : f32
      %11 = vector.broadcast %cst : f32 to vector<96x3xf32>
      %c0_8 = arith.constant 0 : index
      %c0_9 = arith.constant 0 : index
      %12 = vector.load %arg3[%c0_8, %c0_9] : memref<96x3xf32, #tpu.memory_space<vmem>>, vector<96x3xf32>
      tpu.vector_store %arg3[%c0_8, %c0_9], %11 {strides = array<i32>} : memref<96x3xf32, #tpu.memory_space<vmem>>, vector<96x3xf32>,
    } else {
    }
    %c0 = arith.constant 0 : index
    %c0_1 = arith.constant 0 : index
    %3 = vector.load %arg1[%c0, %c0_1] : memref<96x3xf32, #tpu.memory_space<vmem>>, vector<96x3xf32>
    %c0_2 = arith.constant 0 : index
    %c0_3 = arith.constant 0 : index
    %4 = vector.load %arg3[%c0_2, %c0_3] : memref<96x3xf32, #tpu.memory_space<vmem>>, vector<96x3xf32>
    %5 = arith.mulf %3, %3 : vector<96x3xf32>
    %6 = arith.addf %4, %5 : vector<96x3xf32>
    %c0_4 = arith.constant 0 : index
    %c0_5 = arith.constant 0 : index
    %7 = vector.load %arg3[%c0_4, %c0_5] : memref<96x3xf32, #tpu.memory_space<vmem>>, vector<96x3xf32>
    tpu.vector_store %arg3[%c0_4, %c0_5], %6 {strides = array<i32>} : memref<96x3xf32, #tpu.memory_space<vmem>>, vector<96x3xf32>,
    %c0_i32_6 = arith.constant 0 : i32
    %8 = arith.cmpi eq, %arg0, %c0_i32_6 : i32
    %9 = arith.extui %8 : i1 to i32
    %c0_i32_7 = arith.constant 0 : i32
    %10 = arith.cmpi ne, %9, %c0_i32_7 : i32
    scf.if %10 {
      %c0_8 = arith.constant 0 : index
      %c0_9 = arith.constant 0 : index
      %11 = vector.load %arg3[%c0_8, %c0_9] : memref<96x3xf32, #tpu.memory_space<vmem>>, vector<96x3xf32>
      %12 = vector.shape_cast %11 : vector<96x3xf32> to vector<1x96x3xf32>
      %cst = arith.constant dense<0.000000e+00> : vector<1xf32>
      %13 = vector.multi_reduction <add>, %12, %cst [1, 2] : vector<1x96x3xf32> to vector<1xf32>
      %14 = vector.shape_cast %13 : vector<1xf32> to vector<1x1x1xf32>
      %15 = vector.extract %14[0, 0, 0] : f32 from vector<1x1x1xf32>
      %16 = vector.broadcast %15 : f32 to vector<1x1xf32>
      %c0_10 = arith.constant 0 : index
      %c0_11 = arith.constant 0 : index
      %17 = vector.load %arg2[%c0_10, %c0_11] : memref<1x1xf32, #tpu.memory_space<vmem>>, vector<1x1xf32>
      tpu.vector_store %arg2[%c0_10, %c0_11], %16 {strides = array<i32>} : memref<1x1xf32, #tpu.memory_space<vmem>>, vector<1x1xf32>,
    } else {
    }
    return
  }
  func.func @transform_0(%arg0: i32) -> (i32, i32) {
    %c0_i32 = arith.constant 0 : i32
    %c0_i32_0 = arith.constant 0 : i32
    return %arg0, %c0_i32 : i32, i32
  }
  func.func @transform_1(%arg0: i32) -> (i32, i32) {
    %c0_i32 = arith.constant 0 : i32
    %c0_i32_0 = arith.constant 0 : i32
    %c0_i32_1 = arith.constant 0 : i32
    return %c0_i32, %c0_i32_0 : i32, i32
  }
}

</mosaic_0001>

<bundles_post_ra>
// kernel: tpu_custom_call.1
= control target key start
LH: loop header
LB: loop body
LE: loop exit
PB: predicated region body
PF: predicated region fallthrough
CT: control target
= control target key end

     0   :  { %vm13_vm0 = vcmask 23552   ;;  %v179_v0 = vmov 0.0   ;;  %s275_s0 = inlined_call_operand.vmem [shape: f32[96,3], index: 0, kind: input, shape index: {}]   ;;  %s276_s1 = inlined_call_operand.hbm [shape: f32[1,1], index: 1, kind: output, shape index: {}]  }
   0x1   :  { %14 = vst.msk [vmem:[#allocation2] sm:$0xff] %vm13_vm0, %v179_v0  ;;  %15 = vst.msk [vmem:[#allocation2 + $0x8] sm:$0xff] %vm13_vm0, %v179_v0  ;;  %v26_v1 = vld [vmem:[%s275_s0] sm:$0xff]  ;;  %v27_v2 = vld [vmem:[%s275_s0 + $0x8] sm:$0xff] }
   0x2   :  { %16 = vst.msk [vmem:[#allocation2 + $0x10] sm:$0xff] %vm13_vm0, %v179_v0  ;;  %17 = vst.msk [vmem:[#allocation2 + $0x18] sm:$0xff] %vm13_vm0, %v179_v0  ;;  %v28_v3 = vld [vmem:[%s275_s0 + $0x10] sm:$0xff]  ;;  %v29_v4 = vld [vmem:[%s275_s0 + $0x18] sm:$0xff] }
   0x3   :  { %18 = vst.msk [vmem:[#allocation2 + $0x20] sm:$0xff] %vm13_vm0, %v179_v0  ;;  %19 = vst.msk [vmem:[#allocation2 + $0x28] sm:$0xff] %vm13_vm0, %v179_v0  ;;  %v30_v5 = vld [vmem:[%s275_s0 + $0x20] sm:$0xff]  ;;  %v31_v6 = vld [vmem:[%s275_s0 + $0x28] sm:$0xff] }
   0x4   :  { %20 = vst.msk [vmem:[#allocation2 + $0x30] sm:$0xff] %vm13_vm0, %v179_v0  ;;  %21 = vst.msk [vmem:[#allocation2 + $0x38] sm:$0xff] %vm13_vm0, %v179_v0  ;;  %v32_v7 = vld [vmem:[%s275_s0 + $0x30] sm:$0xff]  ;;  %v33_v8 = vld [vmem:[%s275_s0 + $0x38] sm:$0xff] }
   0x5   :  { %22 = vst.msk [vmem:[#allocation2 + $0x40] sm:$0xff] %vm13_vm0, %v179_v0  ;;  %23 = vst.msk [vmem:[#allocation2 + $0x48] sm:$0xff] %vm13_vm0, %v179_v0  ;;  %v34_v9 = vld [vmem:[%s275_s0 + $0x40] sm:$0xff] }
   0x6   :  { %24 = vst.msk [vmem:[#allocation2 + $0x50] sm:$0xff] %vm13_vm0, %v179_v0  ;;  %25 = vst.msk [vmem:[#allocation2 + $0x58] sm:$0xff] %vm13_vm0, %v179_v0 }
   0x7   :  { %6 = vsyncpa [#allocation4], 0  ;;  %v35_v10 = vld [vmem:[%s275_s0 + $0x48] sm:$0xff]  ;;  %v36_v11 = vld [vmem:[%s275_s0 + $0x50] sm:$0xff]  ;;  %v50_v13 = vmul.f32 %v26_v1, %v26_v1  ;;  %v51_v14 = vmul.f32 %v27_v2, %v27_v2  ;;  %v52_v15 = vmul.f32 %v28_v3, %v28_v3  ;;  %v53_v16 = vmul.f32 %v29_v4, %v29_v4 }
   0x8   :  { %v37_v12 = vld [vmem:[%s275_s0 + $0x58] sm:$0xff]  ;;  %v54_v17 = vmul.f32 %v30_v5, %v30_v5  ;;  %v55_v18 = vmul.f32 %v31_v6, %v31_v6  ;;  %v56_v19 = vmul.f32 %v32_v7, %v32_v7  ;;  %v57_v20 = vmul.f32 %v33_v8, %v33_v8  ;;  %v38_v22 = vld [vmem:[#allocation2] sm:$0xff]  ;;  %v39_v23 = vld [vmem:[#allocation2 + $0x8] sm:$0xff]  ;;  %s180_s0 = smov [#allocation3]  }
   0x9   :  { %v58_v21 = vmul.f32 %v34_v9, %v34_v9  ;;  %v40_v24 = vld [vmem:[#allocation2 + $0x10] sm:$0xff]  ;;  %v59_v25 = vmul.f32 %v35_v10, %v35_v10  ;;  %v60_v26 = vmul.f32 %v36_v11, %v36_v11  ;;  %v61_v27 = vmul.f32 %v37_v12, %v37_v12  ;;  %v41_v28 = vld [vmem:[#allocation2 + $0x18] sm:$0xff]  ;;  %s143_s30 = sshll.u32 %s180_s0, 4  ;;  %s144_s30 = int_to_ptr.vmem [resolvable:$true] %s143_s30 }
   0xa   :  { %v42_v29 = vld [vmem:[#allocation2 + $0x20] sm:$0xff]  ;;  %v43_v30 = vld [vmem:[#allocation2 + $0x28] sm:$0xff]  ;;  %v62_v31 = vadd.f32 %v50_v13, %v38_v22  ;;  %v63_v32 = vadd.f32 %v51_v14, %v39_v23  ;;  %v64_v33 = vadd.f32 %v52_v15, %v40_v24  ;;  %v65_v37 = vadd.f32 %v53_v16, %v41_v28  ;;  %s155_s3 = scalar_lea.vmem %s144_s30, 16  ;;  %s159_s4 = scalar_lea.vmem %s144_s30, 32 }
   0xb   :  { %v44_v34 = vld [vmem:[#allocation2 + $0x30] sm:$0xff]  ;;  %v45_v35 = vld [vmem:[#allocation2 + $0x38] sm:$0xff]  ;;  %v66_v38 = vadd.f32 %v54_v17, %v42_v29  ;;  %v67_v39 = vadd.f32 %v55_v18, %v43_v30  ;;  %vm135_vm1 = vcmask 0   ;;  %p156_p0 = scmp.ne.s32.totalorder %s144_s30, %s155_s3  ;;  %p160_p1 = scmp.lt.s32.totalorder %s144_s30, %s144_s30 }
   0xc   :  { %v46_v36 = vld [vmem:[#allocation2 + $0x40] sm:$0xff]  ;;  %v47_v40 = vld [vmem:[#allocation2 + $0x48] sm:$0xff]  ;;  %v68_v43 = vadd.f32 %v56_v19, %v44_v34  ;;  %v69_v44 = vadd.f32 %v57_v20, %v45_v35  ;;  %75 = vst.msk [vmem:[#allocation2] sm:$0xff] %vm13_vm0, %v62_v31  ;;  %76 = vst.msk [vmem:[#allocation2 + $0x8] sm:$0xff] %vm13_vm0, %v63_v32  ;;  %p161_p2 = scmp.lt.s32.totalorder %s159_s4, %s155_s3 }
   0xd   :  { %v48_v41 = vld [vmem:[#allocation2 + $0x50] sm:$0xff]  ;;  %v49_v42 = vld [vmem:[#allocation2 + $0x58] sm:$0xff]  ;;  %v70_v45 = vadd.f32 %v58_v21, %v46_v36  ;;  %77 = vst.msk [vmem:[#allocation2 + $0x10] sm:$0xff] %vm13_vm0, %v64_v33  ;;  %v71_v46 = vadd.f32 %v59_v25, %v47_v40  ;;  %78 = vst.msk [vmem:[#allocation2 + $0x18] sm:$0xff] %vm13_vm0, %v65_v37 }
   0xe   :  { %v72_v47 = vadd.f32 %v60_v26, %v48_v41  ;;  %v73_v48 = vadd.f32 %v61_v27, %v49_v42  ;;  %79 = vst.msk [vmem:[#allocation2 + $0x20] sm:$0xff] %vm13_vm0, %v66_v38  ;;  %80 = vst.msk [vmem:[#allocation2 + $0x28] sm:$0xff] %vm13_vm0, %v67_v39  ;;  %p162_p3 = por %p161_p2, %p160_p1 }
   0xf   :  { %81 = vst.msk [vmem:[#allocation2 + $0x30] sm:$0xff] %vm13_vm0, %v68_v43  ;;  %82 = vst.msk [vmem:[#allocation2 + $0x38] sm:$0xff] %vm13_vm0, %v69_v44 }
  0x10   :  { %83 = vst.msk [vmem:[#allocation2 + $0x40] sm:$0xff] %vm13_vm0, %v70_v45  ;;  %84 = vst.msk [vmem:[#allocation2 + $0x48] sm:$0xff] %vm13_vm0, %v71_v46  ;;  %p163_p4 = pnand %p162_p3, %p156_p0 }
  0x11   :  { %85 = vst.msk [vmem:[#allocation2 + $0x50] sm:$0xff] %vm13_vm0, %v72_v47  ;;  %86 = vst.msk [vmem:[#allocation2 + $0x58] sm:$0xff] %vm13_vm0, %v73_v48 }
  0x13   :  { %v90_v49 = vld [vmem:[#allocation2] sm:$0xff]  ;;  %v91_v50 = vld [vmem:[#allocation2 + $0x8] sm:$0xff] }
  0x14   :  { %v92_v51 = vld [vmem:[#allocation2 + $0x10] sm:$0xff]  ;;  %v93_v52 = vld [vmem:[#allocation2 + $0x18] sm:$0xff]  ;;  %v102_v53 = vsel %vm13_vm0, %v90_v49, 0.0  ;;  %v103_v54 = vsel %vm13_vm0, %v91_v50, 0.0 }
  0x15   :  { %v105_v55 = vsel %vm13_vm0, %v92_v51, 0.0  ;;  %v94_v56 = vld [vmem:[#allocation2 + $0x20] sm:$0xff]  ;;  %v104_v57 = vadd.f32 %v103_v54, %v102_v53  ;;  %v107_v58 = vsel %vm13_vm0, %v93_v52, 0.0  ;;  %v95_v59 = vld [vmem:[#allocation2 + $0x28] sm:$0xff] }
  0x16   :  { %v109_v61 = vsel %vm13_vm0, %v94_v56, 0.0  ;;  %v96_v62 = vld [vmem:[#allocation2 + $0x30] sm:$0xff]  ;;  %v111_v0 = vsel %vm13_vm0, %v95_v59, 0.0  ;;  %v97_v1 = vld [vmem:[#allocation2 + $0x38] sm:$0xff] }
  0x17   :  { %v106_v60 = vadd.f32 %v105_v55, %v104_v57  ;;  %v113_v3 = vsel %vm13_vm0, %v96_v62, 0.0  ;;  %v98_v4 = vld [vmem:[#allocation2 + $0x40] sm:$0xff]  ;;  %v115_v6 = vsel %vm13_vm0, %v97_v1, 0.0  ;;  %v99_v7 = vld [vmem:[#allocation2 + $0x48] sm:$0xff] }
  0x18   :  { %v117_v9 = vsel %vm13_vm0, %v98_v4, 0.0  ;;  %v100_v10 = vld [vmem:[#allocation2 + $0x50] sm:$0xff]  ;;  %v119_v12 = vsel %vm13_vm0, %v99_v7, 0.0  ;;  %v101_v13 = vld [vmem:[#allocation2 + $0x58] sm:$0xff] }
  0x19   :  { %v108_v63 = vadd.f32 %v107_v58, %v106_v60  ;;  %v121_v15 = vsel %vm13_vm0, %v100_v10, 0.0  ;;  %v123_v17 = vsel %vm13_vm0, %v101_v13, 0.0 }
  0x1b   :  { %v110_v2 = vadd.f32 %v109_v61, %v108_v63 }
  0x1d   :  { %v112_v5 = vadd.f32 %v111_v0, %v110_v2 }
  0x1f   :  { %v114_v8 = vadd.f32 %v113_v3, %v112_v5 }
  0x21   :  { %v116_v11 = vadd.f32 %v115_v6, %v114_v8 }
  0x23   :  { %v118_v14 = vadd.f32 %v117_v9, %v116_v11 }
  0x25   :  { %v120_v16 = vadd.f32 %v119_v12, %v118_v14 }
  0x27   :  { %v122_v18 = vadd.f32 %v121_v15, %v120_v16 }
  0x29   :  { %v124_v19 = vadd.f32 %v123_v17, %v122_v18 }
  0x2b   :  { %125 = vadd.xlane.f32.xlu0 %v124_v19 }
  0xb8   :  { %v126_v20 = vpop.xlane.xlu0 %125 }
  0xb9   :  { %v127_v21 = vrot.slane %v126_v20, 4 }
  0xbb   :  { %v128_v22 = vadd.f32 %v127_v21, %v126_v20 }
  0xbd   :  { %v129_v23 = vrot.slane %v128_v22, 2 }
  0xbf   :  { %v130_v24 = vadd.f32 %v129_v23, %v128_v22 }
  0xc1   :  { %v131_v25 = vrot.slane %v130_v24, 1 }
  0xc3   :  { %v132_v26 = vadd.f32 %v131_v25, %v130_v24 }
  0xc5   :  { %151 = vpush %v132_v26 }
  0xf6   :  { %s152_s2 = spop %151 }
  0xf7   :  { %v134_v27 = vstv %s152_s2 }
  0xf8   :  { %136 = vst.msk [vmem:[#allocation3] sm:$0x1] %vm135_vm1, %v134_v27 }
  0xf9   :  { %166 = shalt.err (!%p163_p4)
}
  0xfa   :  { %s167_s7 = scalar_lea.hbm %s276_s1, 16 }
  0xfb   :  { %p168_p5 = scmp.ne.s32.totalorder %s276_s1, %s167_s7  ;;  %p171_p6 = scmp.lt.u32.totalorder %s167_s7, %s276_s1 }
  0xfd   :  { %p173_p7 = pnand %p171_p6, %p168_p5 }
  0xff   :  { %176 = shalt.err (!%p173_p7)
}
 0x100   :  { %146 = dma.vmem_to_hbm [thread:$0]  %s144_s30, 16, %s276_s1, [#allocation4]  }
 0x101   :  { %177 = dma.done.wait [#allocation4], 16  }
 0x102   :  { %178 = vsyncadd [#allocation4], 4294967280 }
 0x103   :  { %150 = vsyncpa [#allocation4], 1 }

</bundles_post_ra>
